<compile_context>
chip_gen: v6e
topology: v6e:2x2x1
jax: 0.10.0
libtpu: 0.0.40
codegen_flags: <defaults>
</compile_context>

<pallas_src>
import functools

import jax
import jax.numpy as jnp
from jax.experimental import pallas as pl
from jax.experimental.pallas import tpu as pltpu

IN_FEATURES = 10
OUT_FEATURES = 10
LANE = 128        # TPU lane width (RHS / bias padding)
DEFAULT_TB = 512  # batch tile for large B (multiple of 8, ~85% of HBM roofline)


def _round_up(x, m):
    return ((x + m - 1) // m) * m


def _linear_kernel(x_ref, wt_ref, b_ref, o_ref):
    # x_ref: (TB, K)  wt_ref: (K, Np)  b_ref: (1, Np)  o_ref: (TB, N_out)
    n_out = o_ref.shape[-1]
    # Single MXU matmul with f32 accumulation on a lane-dense RHS.
    y = jnp.dot(x_ref[...], wt_ref[...], preferred_element_type=jnp.float32)
    # One VPU add (hidden under the memory pipeline), then store only the real
    # columns: HBM writeback is 40 B/row instead of 512 B/row + external slice.
    y = y + b_ref[...]
    o_ref[...] = y[:, :n_out].astype(o_ref.dtype)


def prepare_linear_params(weight, bias):
    """One-time param reshuffle (do this at init, not per call).

    weight: [out, in] (PyTorch layout), bias: [out]
    Returns (wt_padded [in, Np], bias_padded [1, Np], out_features)
    with Np = out rounded up to 128 so the kernel's RHS/bias are lane-dense.
    """
    n_out, k_in = weight.shape
    n_pad = _round_up(n_out, LANE)
    wt = jnp.zeros((k_in, n_pad), weight.dtype).at[:, :n_out].set(weight.T)
    b2 = jnp.zeros((1, n_pad), bias.dtype).at[0, :n_out].set(bias)
    return wt, b2, n_out


@functools.partial(jax.jit, static_argnums=(3,))
def linear_forward(x, wt_padded, bias_padded, out_features):
    """y = x @ W^T + b using pre-transposed / lane-padded params."""
    B, K = x.shape
    K2, Np = wt_padded.shape
    assert K == K2, "in_features mismatch"

    # Batch tile: multiple of 8 sublanes, capped at DEFAULT_TB.  For tiny B
    # this is a single grid step; for large B it pipelines and (on v7x) shards
    # across both TensorCores.  pl.cdiv handles a ragged tail block (output
    # writeback for out-of-bounds rows is masked; rows are independent).
    TB = min(DEFAULT_TB, _round_up(B, 8))
    grid = (pl.cdiv(B, TB),)

    return pl.pallas_call(
        _linear_kernel,
        out_shape=jax.ShapeDtypeStruct((B, out_features), x.dtype),
        grid_spec=pltpu.PrefetchScalarGridSpec(
            num_scalar_prefetch=0,
            grid=grid,
            in_specs=[
                # x: tiled over the batch.
                pl.BlockSpec((TB, K), lambda i: (i, 0)),
                # W^T and bias: grid-invariant -> DMA'd once, resident in VMEM.
                pl.BlockSpec((K, Np), lambda i: (0, 0)),
                pl.BlockSpec((1, Np), lambda i: (0, 0)),
            ],
            out_specs=pl.BlockSpec((TB, out_features), lambda i: (i, 0)),
        ),
        compiler_params=pltpu.CompilerParams(
            dimension_semantics=("parallel",),
        ),
    )(x, wt_padded, bias_padded)


class MyModuleJAX:
    """JAX/Pallas equivalent of the PyTorch MyModule.

    Holds:
      - linear weight [10, 10] and bias [10]  (the only params used in forward)
      - cust_param [10, 10]                    (unused in forward, kept for parity)
    """

    def __init__(self, key):
        k_w, k_b, k_c = jax.random.split(key, 3)
        # Deterministic init mimicking nn.Linear's uniform init range.
        bound = 1.0 / (IN_FEATURES ** 0.5)
        self.weight = jax.random.uniform(
            k_w, (OUT_FEATURES, IN_FEATURES), jnp.float32, -bound, bound
        )
        self.bias = jax.random.uniform(
            k_b, (OUT_FEATURES,), jnp.float32, -bound, bound
        )
        # cust_param ~ torch.randn(10, 10); not used in forward.
        self.cust_param = jax.random.normal(k_c, (10, 10), jnp.float32)
        # TODO(synk): cust_param.load_weight lambda (side-effecting print hook) has no
        # Pallas/JAX equivalent; it does not affect forward semantics.

        # One-time reshuffle: transposed + lane-padded params for the kernel.
        self._wt_padded, self._bias_padded, self._n_out = prepare_linear_params(
            self.weight, self.bias
        )

    def __call__(self, x):
        return linear_forward(x, self._wt_padded, self._bias_padded, self._n_out)


if __name__ == "__main__":
    key = jax.random.PRNGKey(0)
    k_param, k_x = jax.random.split(key)

    module = MyModuleJAX(k_param)

    batch = 8
    x = jax.random.normal(k_x, (batch, IN_FEATURES), jnp.float32)

    y = module(x)
    y = jax.block_until_ready(y)

    # Reference check against plain JAX (original PyTorch-layout params).
    # MXU f32 matmul may differ by a few ULP from the XLA reference.
    y_ref = x @ module.weight.T + module.bias
    assert y.shape == (batch, OUT_FEATURES)
    assert jnp.allclose(y, y_ref, atol=1e-5, rtol=1e-5)

    print("KERNEL_OK")
</pallas_src>

<mosaic_0001>
module attributes {stable_mosaic.version = 11 : i64} {
  func.func @_linear_kernel(%arg0: i32, %arg1: memref<8x10xf32, #tpu.memory_space<vmem>>, %arg2: memref<10x128xf32, #tpu.memory_space<vmem>>, %arg3: memref<1x128xf32, #tpu.memory_space<vmem>>, %arg4: memref<8x10xf32, #tpu.memory_space<vmem>>) attributes {dimension_semantics = [#tpu.dimension_semantics<parallel>], iteration_bounds = array<i64: 1>, scalar_prefetch = 0 : i64, scratch_operands = 0 : i64, tpu.core_type = #tpu.core_type<tc>, window_params = [{transform_indices = @transform_0, window_bounds = array<i64: 8, 10>}, {pipeline_mode = #tpu.pipeline_mode<synchronous>, transform_indices = @transform_1, window_bounds = array<i64: 10, 128>}, {pipeline_mode = #tpu.pipeline_mode<synchronous>, transform_indices = @transform_2, window_bounds = array<i64: 1, 128>}, {transform_indices = @transform_3, window_bounds = array<i64: 8, 10>}]} {
    %c0 = arith.constant 0 : index
    %c0_0 = arith.constant 0 : index
    %0 = vector.load %arg1[%c0, %c0_0] : memref<8x10xf32, #tpu.memory_space<vmem>>, vector<8x10xf32>
    %c0_1 = arith.constant 0 : index
    %c0_2 = arith.constant 0 : index
    %1 = vector.load %arg2[%c0_1, %c0_2] : memref<10x128xf32, #tpu.memory_space<vmem>>, vector<10x128xf32>
    %cst = arith.constant dense<0.000000e+00> : vector<8x128xf32>
    %2 = tpu.matmul %0, %1, %cst {dimension_numbers = #tpu.dot_dimension_numbers<[1], [0], [0], [1], [0, 0, 1, 1], [], []>} : vector<8x10xf32>, vector<10x128xf32>, vector<8x128xf32> -> vector<8x128xf32>
    %c0_3 = arith.constant 0 : index
    %c0_4 = arith.constant 0 : index
    %3 = vector.load %arg3[%c0_3, %c0_4] : memref<1x128xf32, #tpu.memory_space<vmem>>, vector<1x128xf32>
    %4 = vector.broadcast %3 : vector<1x128xf32> to vector<8x128xf32>
    %5 = arith.addf %2, %4 : vector<8x128xf32>
    %6 = vector.extract_strided_slice %5 {offsets = [0, 0], sizes = [8, 10], strides = [1, 1]} : vector<8x128xf32> to vector<8x10xf32>
    %c0_5 = arith.constant 0 : index
    %c0_6 = arith.constant 0 : index
    %7 = vector.load %arg4[%c0_5, %c0_6] : memref<8x10xf32, #tpu.memory_space<vmem>>, vector<8x10xf32>
    tpu.vector_store %arg4[%c0_5, %c0_6], %6 {strides = array<i32>} : memref<8x10xf32, #tpu.memory_space<vmem>>, vector<8x10xf32>,
    return
  }
  func.func @transform_0(%arg0: i32) -> (i32, i32) {
    %c0_i32 = arith.constant 0 : i32
    %c0_i32_0 = arith.constant 0 : i32
    return %arg0, %c0_i32 : i32, i32
  }
  func.func @transform_1(%arg0: i32) -> (i32, i32) {
    %c0_i32 = arith.constant 0 : i32
    %c0_i32_0 = arith.constant 0 : i32
    %c0_i32_1 = arith.constant 0 : i32
    return %c0_i32, %c0_i32_0 : i32, i32
  }
  func.func @transform_2(%arg0: i32) -> (i32, i32) {
    %c0_i32 = arith.constant 0 : i32
    %c0_i32_0 = arith.constant 0 : i32
    %c0_i32_1 = arith.constant 0 : i32
    return %c0_i32, %c0_i32_0 : i32, i32
  }
  func.func @transform_3(%arg0: i32) -> (i32, i32) {
    %c0_i32 = arith.constant 0 : i32
    %c0_i32_0 = arith.constant 0 : i32
    return %arg0, %c0_i32 : i32, i32
  }
}

</mosaic_0001>

<bundles_post_ra>
// kernel: linear_forward.1
= control target key start
LH: loop header
LB: loop body
LE: loop exit
PB: predicated region body
PF: predicated region fallthrough
CT: control target
= control target key end

     0   :  { %8 = vsyncpa [#allocation3], 0  ;;  %s271_s0 = inlined_call_operand.hbm [shape: f32[8,10], index: 0, kind: input, shape index: {}]   ;;  %s272_s1 = inlined_call_operand.hbm [shape: f32[10,128], index: 1, kind: input, shape index: {}]   ;;  %s273_s2 = inlined_call_operand.vmem [shape: f32[1,128], index: 2, kind: input, shape index: {}]   ;;  %s274_s3 = inlined_call_operand.hbm [shape: f32[8,10], index: 3, kind: output, shape index: {}]  }
   0x1   :  { %9 = vsyncpa [#allocation6], 0 }
   0x2   :  { %10 = vsyncpa [#allocation4], 0  ;;  %s232_s12 = smov [#allocation2]   ;;  %s233_s14 = smov [#allocation5]  }
   0x3   :  { %s17_s13 = sshll.u32 %s232_s12, 4  ;;  %s26_s15 = sshll.u32 %s233_s14, 4  ;;  %s18_s13 = int_to_ptr.vmem [resolvable:$true] %s17_s13  ;;  %s27_s15 = int_to_ptr.vmem [resolvable:$true] %s26_s15 }
   0x4   :  { %s174_s16 = scalar_lea.vmem %s18_s13, 128  ;;  %p179_p1 = scmp.lt.s32.totalorder %s18_s13, %s18_s13 }
   0x5   :  { %p175_p0 = scmp.ne.s32.totalorder %s18_s13, %s174_s16  ;;  %p180_p2 = scmp.lt.s32.totalorder %s174_s16, %s174_s16 }
   0x7   :  { %p181_p3 = por %p180_p2, %p179_p1 }
   0x9   :  { %p182_p4 = pnand %p181_p3, %p175_p0 }
   0xb   :  { %185 = shalt.err (!%p182_p4)
}
   0xc   :  { %20 = dma.hbm_to_vmem [thread:$0]  %s271_s0, 128, %s18_s13, [#allocation3]  }
   0xd   :  { %s194_s19 = scalar_lea.vmem %s27_s15, 256  ;;  %p199_p6 = scmp.lt.s32.totalorder %s27_s15, %s27_s15 }
   0xe   :  { %p195_p5 = scmp.ne.s32.totalorder %s27_s15, %s194_s19  ;;  %p200_p7 = scmp.lt.s32.totalorder %s194_s19, %s194_s19 }
  0x10   :  { %p201_p8 = por %p200_p7, %p199_p6 }
  0x12   :  { %p202_p9 = pnand %p201_p8, %p195_p5 }
  0x14   :  { %205 = shalt.err (!%p202_p9)
}
  0x15   :  { %s234_s20 = smov 128   ;;  %s235_s21 = smov 8  }
  0x16   :  { %32 = dma.hbm_to_vmem [thread:$0]  %s272_s1, 256, %s27_s15, [#allocation6], %s234_s20, %s234_s20, %s235_s21  }
  0x17   :  { %226 = dma.done.wait [#allocation3], 128  }
  0x18   :  { %227 = vsyncadd [#allocation3], 4294967168 }
  0x19   :  { %228 = dma.done.wait [#allocation6], 256  }
  0x1a   :  { %229 = vsyncadd [#allocation6], 4294967040  ;;  %v236_v0 = vmov 0.0   ;;  %vm237_vm0 = vmmov 0   ;;  %vm55_vm1 = vcmask 1041408   ;;  %v42_v2 = vld [vmem:[#allocation5] sm:$0xff] }
  0x1b   :  { %152 = vmatprep.subr.mxu0 %v236_v0  ;;  %156 = vmatprep.mubr.msk.f32.mxu0 %vm237_vm0, %v236_v0  ;;  %v43_v1 = vld [vmem:[#allocation5 + $0x8] sm:$0x3]  ;;  %v41_v3 = vld [vmem:[#allocation2] sm:$0xff]  ;;  %vm51_vm2 = vcmask 80896   ;;  %s238_s1 = smov [#allocation7]  }
  0x1c   :  { %153 = vmatpush3.msk.msra.mxu0 %vm55_vm1, %v43_v1  ;;  %v146_v4 = vld [vmem:[%s273_s2] ss:$0 sm:$0xff]  ;;  %s136_s25 = sshll.u32 %s238_s1, 4  ;;  %s137_s25 = int_to_ptr.vmem [resolvable:$true] %s136_s25 }
  0x1d   :  { %154 = vmatprep.subr.mxu0 %v236_v0  ;;  %s206_s26 = scalar_lea.vmem %s137_s25, 128  ;;  %p211_p11 = scmp.lt.s32.totalorder %s137_s25, %s137_s25 }
  0x1e   :  { %155 = vmatpush3.msra.mxu0 %v42_v2  ;;  %p207_p10 = scmp.ne.s32.totalorder %s137_s25, %s206_s26  ;;  %p212_p12 = scmp.lt.s32.totalorder %s206_s26, %s206_s26 }
  0x1f   :  { %157 = vmatmul.mubr.msk.f32.vlgmr.msra.gmra.mxu0 %vm51_vm2, %v41_v3 }
  0x20   :  { %p213_p13 = por %p212_p12, %p211_p11 }
  0x22   :  { %p214_p0 = pnand %p213_p13, %p207_p10 }
  0xdf   :  { %v125_v5 = vpop.f32.mrf.mxu0 }
  0xe0   :  { %v126_v6 = vadd.f32 %v146_v4, %v125_v5 }
  0xe1   :  { %v158_v7 = vpop.f32.mrf.mxu0 }
  0xe2   :  { %129 = vst.msk [vmem:[#allocation7] sm:$0xff] %vm51_vm2, %v126_v6 }
  0xe3   :  { %217 = shalt.err (!%p214_p0)
}
  0xe4   :  { %139 = dma.vmem_to_hbm [thread:$0]  %s137_s25, 128, %s274_s3, [#allocation4]  }
  0xe5   :  { %230 = dma.done.wait [#allocation4], 128  }
  0xe6   :  { %231 = vsyncadd [#allocation4], 4294967168 }
  0xe7   :  { %143 = vsyncpa [#allocation3], 1 }
  0xe8   :  { %144 = vsyncpa [#allocation6], 1 }
  0xe9   :  { %145 = vsyncpa [#allocation4], 1 }

</bundles_post_ra>
